<compile_context>
chip_gen: v5e
topology: v5e:2x2
jax: 0.10.0
libtpu: 0.0.40
codegen_flags: <defaults>
</compile_context>

<pallas_src>
import functools

import jax
import jax.numpy as jnp
from jax.experimental import pallas as pl
from jax.experimental.pallas import tpu as pltpu

GROUPS = 16          # batch rows interleaved per 128-lane row (16 * 8 feats = 128)
FEAT_IN = 8


def _sigmoid(z):
    # Exactly 1/(1+exp(-z)), but lowers to a single EUP tanh (review item:
    # cut transcendental count; 13 sigmoids/element, 1 EUP slot/cycle).
    return 0.5 * jnp.tanh(0.5 * z) + 0.5


def mlp_kernel(x_ref, w1_ref, b1_ref, w2_ref, b2_ref,
               w3_ref, b3_ref, w4_ref, b4_ref, o_ref):
    h = x_ref[...]                                    # [tile_r, 128], lane-dense
    for w_ref, b_ref in ((w1_ref, b1_ref), (w2_ref, b2_ref),
                         (w3_ref, b3_ref), (w4_ref, b4_ref)):
        z = jnp.dot(h, w_ref[...], preferred_element_type=jnp.float32) + b_ref[...]
        h = _sigmoid(z)
    # Last matmul is [tile_r,128]@[128,16] -> h is [tile_r, 16]; row-major this
    # is exactly the [batch, 1] output for the 16*tile_r batch rows of this step.
    o_ref[...] = h.astype(o_ref.dtype)


def _expand_weight(w, groups=GROUPS, pad_in=FEAT_IN, pad_out=None):
    """PyTorch-layout weight [out, in] -> block-diagonal interleaved matmul
    weight [groups*pad_in, groups*pad_out].  Rows beyond `in` are zero, so
    garbage lanes from the previous layer never contaminate the result."""
    fout, fin = w.shape
    if pad_out is None:
        pad_out = pad_in
    blk = jnp.zeros((pad_in, pad_out), jnp.float32).at[:fin, :fout].set(w.T)
    return jnp.kron(jnp.eye(groups, dtype=jnp.float32), blk)


def _expand_bias(b, groups=GROUPS, pad_out=FEAT_IN):
    """Bias [out] -> [1, groups*pad_out] interleaved row (zeros in pad lanes)."""
    fout = b.shape[0]
    blk = jnp.zeros((pad_out,), jnp.float32).at[:fout].set(b)
    return jnp.tile(blk, groups)[None, :]


@functools.partial(jax.jit, static_argnames=("tile_rows",))
def mlp_forward(x, params, tile_rows=4096):
    """x: [B, 8] float32 -> [B, 1] float32 (sigmoid MLP 8->6->4->2->1)."""
    B, F = x.shape
    assert F == FEAT_IN

    pad = (-B) % GROUPS
    if pad:
        # TODO(synk): B % 16 != 0 falls back to a full-copy pad; batch sizes
        # that are multiples of 16 keep the wrapper completely zero-copy.
        x = jnp.concatenate([x, jnp.zeros((pad, FEAT_IN), x.dtype)], axis=0)
    Bp = B + pad
    R = Bp // GROUPS
    x_il = x.reshape(R, GROUPS * FEAT_IN)             # free reshape (row-major)

    # Interleaved block-diagonal weights/biases (tiny; built once per call,
    # resident in VMEM across all grid steps via constant index_maps).
    w1 = _expand_weight(params["w1"])                 # [128, 128]
    w2 = _expand_weight(params["w2"])                 # [128, 128]
    w3 = _expand_weight(params["w3"])                 # [128, 128]
    w4 = _expand_weight(params["w4"], pad_out=1)      # [128, 16] (compacts output)
    b1 = _expand_bias(params["b1"])                   # [1, 128]
    b2 = _expand_bias(params["b2"])
    b3 = _expand_bias(params["b3"])
    b4 = _expand_bias(params["b4"], pad_out=1)        # [1, 16]

    # Tile sizing: multiple of 8 sublanes; cap at ~half the rows so v7x's two
    # TensorCores both get work; a single full-extent block for tiny batches.
    half = 8 * pl.cdiv(pl.cdiv(R, 2), 8)
    tile_r = max(8, min(tile_rows, half))
    if tile_r >= R:
        tile_r = R
    grid = (pl.cdiv(R, tile_r),)                      # ragged last block is fine

    def const_spec(a):
        return pl.BlockSpec(a.shape, lambda i: (0, 0))

    args = [x_il]
    in_specs = [pl.BlockSpec((tile_r, GROUPS * FEAT_IN), lambda i: (i, 0))]
    for w, b in ((w1, b1), (w2, b2), (w3, b3), (w4, b4)):
        args += [w, b]
        in_specs += [const_spec(w), const_spec(b)]

    out = pl.pallas_call(
        mlp_kernel,
        out_shape=jax.ShapeDtypeStruct((R, GROUPS), jnp.float32),
        grid=grid,
        in_specs=in_specs,
        out_specs=pl.BlockSpec((tile_r, GROUPS), lambda i: (i, 0)),
        compiler_params=pltpu.CompilerParams(
            dimension_semantics=("parallel",)),
    )(*args)

    out = out.reshape(Bp, 1)                          # free reshape (same layout)
    if pad:
        out = out[:B]
    return out


def init_params(key):
    """Deterministic init mimicking torch.nn.Linear (uniform +/- 1/sqrt(fan_in)).
    Weights in PyTorch layout [out_features, in_features], biases [out_features]."""
    dims = [(8, 6), (6, 4), (4, 2), (2, 1)]
    params = {}
    for i, (fin, fout) in enumerate(dims, start=1):
        key, kw, kb = jax.random.split(key, 3)
        bound = 1.0 / float(jnp.sqrt(float(fin)))
        params[f"w{i}"] = jax.random.uniform(
            kw, (fout, fin), jnp.float32, minval=-bound, maxval=bound)
        params[f"b{i}"] = jax.random.uniform(
            kb, (fout,), jnp.float32, minval=-bound, maxval=bound)
    return params


def reference_forward(x, params):
    h = x
    for i in range(1, 5):
        h = jax.nn.sigmoid(h @ params[f"w{i}"].T + params[f"b{i}"])
    return h


if __name__ == "__main__":
    key = jax.random.PRNGKey(0)
    kx1, kx2, kp = jax.random.split(key, 3)
    params = init_params(kp)

    # Case 1: B=1008 (multiple of 16 -> zero-copy interleave; with the tile cap
    # this gives a 2-step grid with a ragged last block -> masked edge writes).
    B = 1008
    x = jax.random.normal(kx1, (B, FEAT_IN), dtype=jnp.float32)
    out = mlp_forward(x, params)
    jax.block_until_ready(out)
    assert out.shape == (B, 1)
    assert jnp.allclose(out, reference_forward(x, params), atol=1e-5, rtol=1e-5)

    # Case 2: B=1000 (not a multiple of 16 -> pad fallback), small tile so the
    # grid has several steps.
    B2 = 1000
    x2 = jax.random.normal(kx2, (B2, FEAT_IN), dtype=jnp.float32)
    out2 = mlp_forward(x2, params, tile_rows=16)
    jax.block_until_ready(out2)
    assert out2.shape == (B2, 1)
    assert jnp.allclose(out2, reference_forward(x2, params), atol=1e-5, rtol=1e-5)

    print("KERNEL_OK")
</pallas_src>

<mosaic_0001>
module attributes {stable_mosaic.version = 11 : i64} {
  func.func @mlp_kernel(%arg0: i32, %arg1: memref<32x128xf32, #tpu.memory_space<vmem>>, %arg2: memref<128x128xf32, #tpu.memory_space<vmem>>, %arg3: memref<1x128xf32, #tpu.memory_space<vmem>>, %arg4: memref<128x128xf32, #tpu.memory_space<vmem>>, %arg5: memref<1x128xf32, #tpu.memory_space<vmem>>, %arg6: memref<128x128xf32, #tpu.memory_space<vmem>>, %arg7: memref<1x128xf32, #tpu.memory_space<vmem>>, %arg8: memref<128x16xf32, #tpu.memory_space<vmem>>, %arg9: memref<1x16xf32, #tpu.memory_space<vmem>>, %arg10: memref<32x16xf32, #tpu.memory_space<vmem>>) attributes {dimension_semantics = [#tpu.dimension_semantics<parallel>], iteration_bounds = array<i64: 2>, scalar_prefetch = 0 : i64, scratch_operands = 0 : i64, tpu.core_type = #tpu.core_type<tc>, window_params = [{transform_indices = @transform_0, window_bounds = array<i64: 32, 128>}, {pipeline_mode = #tpu.pipeline_mode<synchronous>, transform_indices = @transform_1, window_bounds = array<i64: 128, 128>}, {pipeline_mode = #tpu.pipeline_mode<synchronous>, transform_indices = @transform_2, window_bounds = array<i64: 1, 128>}, {pipeline_mode = #tpu.pipeline_mode<synchronous>, transform_indices = @transform_3, window_bounds = array<i64: 128, 128>}, {pipeline_mode = #tpu.pipeline_mode<synchronous>, transform_indices = @transform_4, window_bounds = array<i64: 1, 128>}, {pipeline_mode = #tpu.pipeline_mode<synchronous>, transform_indices = @transform_5, window_bounds = array<i64: 128, 128>}, {pipeline_mode = #tpu.pipeline_mode<synchronous>, transform_indices = @transform_6, window_bounds = array<i64: 1, 128>}, {pipeline_mode = #tpu.pipeline_mode<synchronous>, transform_indices = @transform_7, window_bounds = array<i64: 128, 16>}, {pipeline_mode = #tpu.pipeline_mode<synchronous>, transform_indices = @transform_8, window_bounds = array<i64: 1, 16>}, {transform_indices = @transform_9, window_bounds = array<i64: 32, 16>}]} {
    %c0 = arith.constant 0 : index
    %c0_0 = arith.constant 0 : index
    %0 = vector.load %arg1[%c0, %c0_0] : memref<32x128xf32, #tpu.memory_space<vmem>>, vector<32x128xf32>
    %c0_1 = arith.constant 0 : index
    %c0_2 = arith.constant 0 : index
    %1 = vector.load %arg2[%c0_1, %c0_2] : memref<128x128xf32, #tpu.memory_space<vmem>>, vector<128x128xf32>
    %cst = arith.constant dense<0.000000e+00> : vector<32x128xf32>
    %2 = tpu.matmul %0, %1, %cst {dimension_numbers = #tpu.dot_dimension_numbers<[1], [0], [0], [1], [0, 0, 1, 1], [], []>} : vector<32x128xf32>, vector<128x128xf32>, vector<32x128xf32> -> vector<32x128xf32>
    %c0_3 = arith.constant 0 : index
    %c0_4 = arith.constant 0 : index
    %3 = vector.load %arg3[%c0_3, %c0_4] : memref<1x128xf32, #tpu.memory_space<vmem>>, vector<1x128xf32>
    %4 = vector.broadcast %3 : vector<1x128xf32> to vector<32x128xf32>
    %5 = arith.addf %2, %4 : vector<32x128xf32>
    %cst_5 = arith.constant 5.000000e-01 : f32
    %6 = vector.broadcast %cst_5 : f32 to vector<32x128xf32>
    %7 = arith.mulf %6, %5 : vector<32x128xf32>
    %8 = math.tanh %7 : vector<32x128xf32>
    %cst_6 = arith.constant 5.000000e-01 : f32
    %9 = vector.broadcast %cst_6 : f32 to vector<32x128xf32>
    %10 = arith.mulf %9, %8 : vector<32x128xf32>
    %cst_7 = arith.constant 5.000000e-01 : f32
    %11 = vector.broadcast %cst_7 : f32 to vector<32x128xf32>
    %12 = arith.addf %10, %11 : vector<32x128xf32>
    %c0_8 = arith.constant 0 : index
    %c0_9 = arith.constant 0 : index
    %13 = vector.load %arg4[%c0_8, %c0_9] : memref<128x128xf32, #tpu.memory_space<vmem>>, vector<128x128xf32>
    %cst_10 = arith.constant dense<0.000000e+00> : vector<32x128xf32>
    %14 = tpu.matmul %12, %13, %cst_10 {dimension_numbers = #tpu.dot_dimension_numbers<[1], [0], [0], [1], [0, 0, 1, 1], [], []>} : vector<32x128xf32>, vector<128x128xf32>, vector<32x128xf32> -> vector<32x128xf32>
    %c0_11 = arith.constant 0 : index
    %c0_12 = arith.constant 0 : index
    %15 = vector.load %arg5[%c0_11, %c0_12] : memref<1x128xf32, #tpu.memory_space<vmem>>, vector<1x128xf32>
    %16 = vector.broadcast %15 : vector<1x128xf32> to vector<32x128xf32>
    %17 = arith.addf %14, %16 : vector<32x128xf32>
    %cst_13 = arith.constant 5.000000e-01 : f32
    %18 = vector.broadcast %cst_13 : f32 to vector<32x128xf32>
    %19 = arith.mulf %18, %17 : vector<32x128xf32>
    %20 = math.tanh %19 : vector<32x128xf32>
    %cst_14 = arith.constant 5.000000e-01 : f32
    %21 = vector.broadcast %cst_14 : f32 to vector<32x128xf32>
    %22 = arith.mulf %21, %20 : vector<32x128xf32>
    %cst_15 = arith.constant 5.000000e-01 : f32
    %23 = vector.broadcast %cst_15 : f32 to vector<32x128xf32>
    %24 = arith.addf %22, %23 : vector<32x128xf32>
    %c0_16 = arith.constant 0 : index
    %c0_17 = arith.constant 0 : index
    %25 = vector.load %arg6[%c0_16, %c0_17] : memref<128x128xf32, #tpu.memory_space<vmem>>, vector<128x128xf32>
    %cst_18 = arith.constant dense<0.000000e+00> : vector<32x128xf32>
    %26 = tpu.matmul %24, %25, %cst_18 {dimension_numbers = #tpu.dot_dimension_numbers<[1], [0], [0], [1], [0, 0, 1, 1], [], []>} : vector<32x128xf32>, vector<128x128xf32>, vector<32x128xf32> -> vector<32x128xf32>
    %c0_19 = arith.constant 0 : index
    %c0_20 = arith.constant 0 : index
    %27 = vector.load %arg7[%c0_19, %c0_20] : memref<1x128xf32, #tpu.memory_space<vmem>>, vector<1x128xf32>
    %28 = vector.broadcast %27 : vector<1x128xf32> to vector<32x128xf32>
    %29 = arith.addf %26, %28 : vector<32x128xf32>
    %cst_21 = arith.constant 5.000000e-01 : f32
    %30 = vector.broadcast %cst_21 : f32 to vector<32x128xf32>
    %31 = arith.mulf %30, %29 : vector<32x128xf32>
    %32 = math.tanh %31 : vector<32x128xf32>
    %cst_22 = arith.constant 5.000000e-01 : f32
    %33 = vector.broadcast %cst_22 : f32 to vector<32x128xf32>
    %34 = arith.mulf %33, %32 : vector<32x128xf32>
    %cst_23 = arith.constant 5.000000e-01 : f32
    %35 = vector.broadcast %cst_23 : f32 to vector<32x128xf32>
    %36 = arith.addf %34, %35 : vector<32x128xf32>
    %c0_24 = arith.constant 0 : index
    %c0_25 = arith.constant 0 : index
    %37 = vector.load %arg8[%c0_24, %c0_25] : memref<128x16xf32, #tpu.memory_space<vmem>>, vector<128x16xf32>
    %cst_26 = arith.constant dense<0.000000e+00> : vector<32x16xf32>
    %38 = tpu.matmul %36, %37, %cst_26 {dimension_numbers = #tpu.dot_dimension_numbers<[1], [0], [0], [1], [0, 0, 1, 1], [], []>} : vector<32x128xf32>, vector<128x16xf32>, vector<32x16xf32> -> vector<32x16xf32>
    %c0_27 = arith.constant 0 : index
    %c0_28 = arith.constant 0 : index
    %39 = vector.load %arg9[%c0_27, %c0_28] : memref<1x16xf32, #tpu.memory_space<vmem>>, vector<1x16xf32>
    %40 = vector.broadcast %39 : vector<1x16xf32> to vector<32x16xf32>
    %41 = arith.addf %38, %40 : vector<32x16xf32>
    %cst_29 = arith.constant 5.000000e-01 : f32
    %42 = vector.broadcast %cst_29 : f32 to vector<32x16xf32>
    %43 = arith.mulf %42, %41 : vector<32x16xf32>
    %44 = math.tanh %43 : vector<32x16xf32>
    %cst_30 = arith.constant 5.000000e-01 : f32
    %45 = vector.broadcast %cst_30 : f32 to vector<32x16xf32>
    %46 = arith.mulf %45, %44 : vector<32x16xf32>
    %cst_31 = arith.constant 5.000000e-01 : f32
    %47 = vector.broadcast %cst_31 : f32 to vector<32x16xf32>
    %48 = arith.addf %46, %47 : vector<32x16xf32>
    %c0_32 = arith.constant 0 : index
    %c0_33 = arith.constant 0 : index
    %49 = vector.load %arg10[%c0_32, %c0_33] : memref<32x16xf32, #tpu.memory_space<vmem>>, vector<32x16xf32>
    tpu.vector_store %arg10[%c0_32, %c0_33], %48 {strides = array<i32>} : memref<32x16xf32, #tpu.memory_space<vmem>>, vector<32x16xf32>,
    return
  }
  func.func @transform_0(%arg0: i32) -> (i32, i32) {
    %c0_i32 = arith.constant 0 : i32
    %c0_i32_0 = arith.constant 0 : i32
    return %arg0, %c0_i32 : i32, i32
  }
  func.func @transform_1(%arg0: i32) -> (i32, i32) {
    %c0_i32 = arith.constant 0 : i32
    %c0_i32_0 = arith.constant 0 : i32
    %c0_i32_1 = arith.constant 0 : i32
    return %c0_i32, %c0_i32_0 : i32, i32
  }
  func.func @transform_2(%arg0: i32) -> (i32, i32) {
    %c0_i32 = arith.constant 0 : i32
    %c0_i32_0 = arith.constant 0 : i32
    %c0_i32_1 = arith.constant 0 : i32
    return %c0_i32, %c0_i32_0 : i32, i32
  }
  func.func @transform_3(%arg0: i32) -> (i32, i32) {
    %c0_i32 = arith.constant 0 : i32
    %c0_i32_0 = arith.constant 0 : i32
    %c0_i32_1 = arith.constant 0 : i32
    return %c0_i32, %c0_i32_0 : i32, i32
  }
  func.func @transform_4(%arg0: i32) -> (i32, i32) {
    %c0_i32 = arith.constant 0 : i32
    %c0_i32_0 = arith.constant 0 : i32
    %c0_i32_1 = arith.constant 0 : i32
    return %c0_i32, %c0_i32_0 : i32, i32
  }
  func.func @transform_5(%arg0: i32) -> (i32, i32) {
    %c0_i32 = arith.constant 0 : i32
    %c0_i32_0 = arith.constant 0 : i32
    %c0_i32_1 = arith.constant 0 : i32
    return %c0_i32, %c0_i32_0 : i32, i32
  }
  func.func @transform_6(%arg0: i32) -> (i32, i32) {
    %c0_i32 = arith.constant 0 : i32
    %c0_i32_0 = arith.constant 0 : i32
    %c0_i32_1 = arith.constant 0 : i32
    return %c0_i32, %c0_i32_0 : i32, i32
  }
  func.func @transform_7(%arg0: i32) -> (i32, i32) {
    %c0_i32 = arith.constant 0 : i32
    %c0_i32_0 = arith.constant 0 : i32
    %c0_i32_1 = arith.constant 0 : i32
    return %c0_i32, %c0_i32_0 : i32, i32
  }
  func.func @transform_8(%arg0: i32) -> (i32, i32) {
    %c0_i32 = arith.constant 0 : i32
    %c0_i32_0 = arith.constant 0 : i32
    %c0_i32_1 = arith.constant 0 : i32
    return %c0_i32, %c0_i32_0 : i32, i32
  }
  func.func @transform_9(%arg0: i32) -> (i32, i32) {
    %c0_i32 = arith.constant 0 : i32
    %c0_i32_0 = arith.constant 0 : i32
    return %arg0, %c0_i32 : i32, i32
  }
}

</mosaic_0001>

<bundles_post_ra>
// kernel: tile.24
= control target key start
LH: loop header
LB: loop body
LE: loop exit
PB: predicated region body
PF: predicated region fallthrough
CT: control target
= control target key end

     0   :  { %s131_s10 = smov 120   ;;  %s132_s11 = smov 104   ;;  %vm3_vm0 = vcmask 64512   ;;  %vm9_vm1 = vcmask 1048512   ;;  %vm15_vm2 = vcmask 982912   ;;  %vm21_vm3 = vcmask 917312   ;;  %s207_s0 = inlined_call_operand.vmem [shape: f32[16,8], index: 0, kind: input, shape index: {}]   ;;  %s208_s1 = inlined_call_operand.vmem [shape: f32[1,128], index: 1, kind: output, shape index: {}]  }
   0x1   :  { %v101_v0 = vld [vmem:[%s207_s0 + $0xf] sm:$0x1]   ;;  %v103_v1 = vld [vmem:[%s207_s0 + $0xd] sm:$0x1]   ;;  %v105_v2 = vld [vmem:[%s207_s0 + $0xb] sm:$0x1]  }
   0x2   :  { %7 = vrot.lane.b32.xlu0 %v101_v0, %s131_s10  ;;  %19 = vrot.lane.b32.xlu1 %v103_v1, %s132_s11  ;;  %s133_s14 = smov 88   ;;  %v102_v3 = vld [vmem:[%s207_s0 + $0xe] sm:$0x1]   ;;  %v104_v4 = vld [vmem:[%s207_s0 + $0xc] sm:$0x1]   ;;  %s134_s19 = smov 112  }
   0x3   :  { %31 = vrot.lane.b32.xlu2 %v105_v2, %s133_s14  ;;  %s135_s20 = smov 96   ;;  %v106_v5 = vld [vmem:[%s207_s0 + $0xa] sm:$0x1]   ;;  %s136_s23 = smov 80   ;;  %v107_v6 = vld [vmem:[%s207_s0 + $0x9] sm:$0x1]  }
   0x4   :  { %v108_v7 = vld [vmem:[%s207_s0 + $0x8] sm:$0x1]   ;;  %s137_s28 = smov 72   ;;  %s138_s29 = smov 64   ;;  %v109_v8 = vld [vmem:[%s207_s0 + $0x7] sm:$0x1]  }
   0x5   :  { %s139_s3 = smov 56   ;;  %v110_v9 = vld [vmem:[%s207_s0 + $0x6] sm:$0x1]   ;;  %v111_v10 = vld [vmem:[%s207_s0 + $0x5] sm:$0x1]   ;;  %s140_s8 = smov 48  }
   0x6   :  { %s141_s9 = smov 40   ;;  %v112_v11 = vld [vmem:[%s207_s0 + $0x4] sm:$0x1]   ;;  %s142_s12 = smov 32   ;;  %v113_v12 = vld [vmem:[%s207_s0 + $0x3] sm:$0x1]  }
   0x7   :  { %v114_v13 = vld [vmem:[%s207_s0 + $0x2] sm:$0x1]   ;;  %s143_s17 = smov 24   ;;  %s144_s18 = smov 16   ;;  %v115_v14 = vld [vmem:[%s207_s0 + $0x1] sm:$0x1]  }
   0x8   :  { %s145_s21 = smov 8   ;;  %v2_v15 = vld [vmem:[%s207_s0] sm:$0x1]   ;;  %vm27_vm4 = vcmask 851712   ;;  %vm33_vm5 = vcmask 786112   ;;  %vm39_vm6 = vcmask 720512  }
   0x9   :  { %4 = vst.msk [vmem:[#allocation0] sm:$0x1] %vm3_vm0, %v2_v15   ;;  %vm45_vm7 = vcmask 654912   ;;  %vm51_vm8 = vcmask 589312   ;;  %vm57_vm9 = vcmask 523712   ;;  %vm63_vm10 = vcmask 458112  }
   0xa   :  { %13 = vrot.lane.b32.xlu0 %v102_v3, %s134_s19  ;;  %25 = vrot.lane.b32.xlu1 %v104_v4, %s135_s20  ;;  %vm69_vm11 = vcmask 392512   ;;  %vm75_vm12 = vcmask 326912   ;;  %vm81_vm13 = vcmask 261312   ;;  %vm87_vm14 = vcmask 195712  }
   0xb   :  { %37 = vrot.lane.b32.xlu2 %v106_v5, %s136_s23  ;;  %vm93_vm15 = vcmask 130112  }
  0x12   :  { %43 = vrot.lane.b32.xlu0 %v107_v6, %s137_s28  ;;  %49 = vrot.lane.b32.xlu1 %v108_v7, %s138_s29 }
  0x13   :  { %55 = vrot.lane.b32.xlu2 %v109_v8, %s139_s3 }
  0x1a   :  { %61 = vrot.lane.b32.xlu0 %v110_v9, %s140_s8  ;;  %67 = vrot.lane.b32.xlu1 %v111_v10, %s141_s9 }
  0x1b   :  { %73 = vrot.lane.b32.xlu2 %v112_v11, %s142_s12 }
  0x22   :  { %79 = vrot.lane.b32.xlu0 %v113_v12, %s143_s17  ;;  %85 = vrot.lane.b32.xlu1 %v114_v13, %s144_s18 }
  0x23   :  { %91 = vrot.lane.b32.xlu2 %v115_v14, %s145_s21 }
  0x5d   :  { %v32_v16 = vpop.permute.xlu2 %31  }
  0x65   :  { %v38_v17 = vpop.permute.xlu2 %37  }
  0x6d   :  { %v56_v18 = vpop.permute.xlu2 %55  }
  0x74   :  { %v8_v19 = vpop.permute.xlu0 %7   ;;  %v20_v20 = vpop.permute.xlu1 %19  }
  0x75   :  { %10 = vst.msk [vmem:[#allocation0] sm:$0x1] %vm9_vm1, %v8_v19   ;;  %v74_v21 = vpop.permute.xlu2 %73  }
  0x7c   :  { %v14_v22 = vpop.permute.xlu0 %13   ;;  %v26_v23 = vpop.permute.xlu1 %25  }
  0x7d   :  { %16 = vst.msk [vmem:[#allocation0] sm:$0x1] %vm15_vm2, %v14_v22   ;;  %v92_v24 = vpop.permute.xlu2 %91  }
  0x7e   :  { %22 = vst.msk [vmem:[#allocation0] sm:$0x1] %vm21_vm3, %v20_v20  }
  0x7f   :  { %28 = vst.msk [vmem:[#allocation0] sm:$0x1] %vm27_vm4, %v26_v23  }
  0x80   :  { %34 = vst.msk [vmem:[#allocation0] sm:$0x1] %vm33_vm5, %v32_v16  }
  0x81   :  { %40 = vst.msk [vmem:[#allocation0] sm:$0x1] %vm39_vm6, %v38_v17  }
  0x84   :  { %v44_v25 = vpop.permute.xlu0 %43   ;;  %v50_v26 = vpop.permute.xlu1 %49  }
  0x85   :  { %46 = vst.msk [vmem:[#allocation0] sm:$0x1] %vm45_vm7, %v44_v25  }
  0x86   :  { %52 = vst.msk [vmem:[#allocation0] sm:$0x1] %vm51_vm8, %v50_v26  }
  0x87   :  { %58 = vst.msk [vmem:[#allocation0] sm:$0x1] %vm57_vm9, %v56_v18  }
  0x8c   :  { %v62_v27 = vpop.permute.xlu0 %61   ;;  %v68_v28 = vpop.permute.xlu1 %67  }
  0x8d   :  { %64 = vst.msk [vmem:[#allocation0] sm:$0x1] %vm63_vm10, %v62_v27  }
  0x8e   :  { %70 = vst.msk [vmem:[#allocation0] sm:$0x1] %vm69_vm11, %v68_v28  }
  0x8f   :  { %76 = vst.msk [vmem:[#allocation0] sm:$0x1] %vm75_vm12, %v74_v21  }
  0x94   :  { %v80_v29 = vpop.permute.xlu0 %79   ;;  %v86_v30 = vpop.permute.xlu1 %85  }
  0x95   :  { %82 = vst.msk [vmem:[#allocation0] sm:$0x1] %vm81_vm13, %v80_v29  }
  0x96   :  { %88 = vst.msk [vmem:[#allocation0] sm:$0x1] %vm87_vm14, %v86_v30  }
  0x97   :  { %94 = vst.msk [vmem:[#allocation0] sm:$0x1] %vm93_vm15, %v92_v24  }
  0x9e   :  { %v97_v31 = vld [vmem:[#allocation0] sm:$0x1] }
  0x9f   :  { %100 = vst [vmem:[%s208_s1] sm:$0x1] %v97_v31 }

// kernel: mlp_forward.1
= control target key start
LH: loop header
LB: loop body
LE: loop exit
PB: predicated region body
PF: predicated region fallthrough
CT: control target
= control target key end

     0   :  { %s774_s30 = smov 0   ;;  %s1006_s0 = inlined_call_operand.vmem [shape: f32[63,128], index: 0, kind: input, shape index: {}]   ;;  %s1007_s1 = inlined_call_operand.vmem [shape: f32[128,128], index: 1, kind: input, shape index: {}]   ;;  %s1008_s2 = inlined_call_operand.vmem [shape: f32[1,128], index: 2, kind: input, shape index: {}]   ;;  %s1009_s3 = inlined_call_operand.vmem [shape: f32[128,128], index: 3, kind: input, shape index: {}]   ;;  %s1010_s4 = inlined_call_operand.vmem [shape: f32[1,128], index: 4, kind: input, shape index: {}]   ;;  %s1011_s5 = inlined_call_operand.vmem [shape: f32[128,128], index: 5, kind: input, shape index: {}]   ;;  %s1012_s6 = inlined_call_operand.vmem [shape: f32[1,128], index: 6, kind: input, shape index: {}]   ;;  %s1013_s7 = inlined_call_operand.vmem [shape: f32[128,16], index: 7, kind: input, shape index: {}]   ;;  %s1014_s8 = inlined_call_operand.vmem [shape: f32[1,16], index: 8, kind: input, shape index: {}]   ;;  %s1015_s9 = inlined_call_operand.vmem [shape: f32[63,16], index: 9, kind: output, shape index: {}]  }
   0x1 LB: > { %s661_s10 = sadd.s32 4294967295, %s722_s30   ;;  %p665_p0 = scmp.ge.s32.totalorder %s722_s30, 1  ;;  %s722_s30 = sphi %s774_s30, %s19_s30  }
   0x2   : > { %p288_p1 = scmp.lt.s32.totalorder %s722_s30, 3 }
   0x4   : > { %p289_p2 = pnand %p665_p0, %p288_p1 }
   0x5   : > { %s666_s27 = sshll.u32 (!%p289_p2), %s661_s10, 2 }
   0x6   : > { %292 = sbr.rel (%p289_p2) target bundleno = 644 (0x284), region = 56  ;;  %p325_p3 = scmp.lt.s32.totalorder (!%p289_p2), %s666_s27, 7 }
   0xb   : > { %v355_v0 = vld [vmem:[%s1007_s1 + $0x78] sm:$0xff]  ;;  %v354_v1 = vld [vmem:[%s1007_s1 + $0x70] sm:$0xff]  ;;  %v353_v2 = vld [vmem:[%s1007_s1 + $0x68] sm:$0xff]  ;;  %s1017_s27 = smov (!%p325_p3, %s666_s27), 7  ;;  %vm600_vm0 = vcmask 130048  }
   0xc   : > { %360 = vmatpush.msra.mxu0 %v355_v0  ;;  %v352_v3 = vld [vmem:[%s1007_s1 + $0x60] sm:$0xff]  ;;  %v351_v4 = vld [vmem:[%s1007_s1 + $0x58] sm:$0xff]  ;;  %v350_v5 = vld [vmem:[%s1007_s1 + $0x50] sm:$0xff]  ;;  %s667_s18 = sshll.u32 %s1017_s27, 3 }
   0xd   : > { %v349_v6 = vld [vmem:[%s1007_s1 + $0x48] sm:$0xff]  ;;  %v348_v7 = vld [vmem:[%s1007_s1 + $0x40] sm:$0xff]  ;;  %v347_v8 = vld [vmem:[%s1007_s1 + $0x38] sm:$0xff]  ;;  %s328_s11 = scalar_lea.vmem %s1006_s0, %s667_s18  ;;  %s334_s26 = scalar_lea.vmem %s1015_s9, %s667_s18 }
   0xe   : > { %361 = vmatpush.msra.mxu0 %v354_v1  ;;  %v346_v9 = vld [vmem:[%s1007_s1 + $0x30] sm:$0xff]  ;;  %v345_v10 = vld [vmem:[%s1007_s1 + $0x28] sm:$0xff]  ;;  %v344_v11 = vld [vmem:[%s1007_s1 + $0x20] sm:$0xff] }
   0xf   : > { %v343_v12 = vld [vmem:[%s1007_s1 + $0x18] sm:$0xff]  ;;  %v342_v13 = vld [vmem:[%s1007_s1 + $0x10] sm:$0xff]  ;;  %v341_v16 = vld [vmem:[%s1007_s1 + $0x8] sm:$0xff] }
  0x10   : > { %362 = vmatpush.msra.mxu0 %v353_v2  ;;  %v420_v14 = vld [vmem:[%s1009_s3 + $0x78] sm:$0xff]  ;;  %v419_v15 = vld [vmem:[%s1009_s3 + $0x70] sm:$0xff]  ;;  %v418_v17 = vld [vmem:[%s1009_s3 + $0x68] sm:$0xff] }
  0x11   : > { %425 = vmatpush.msra.mxu1 %v420_v14  ;;  %v340_v18 = vld [vmem:[%s1007_s1] sm:$0xff]  ;;  %v416_v21 = vld [vmem:[%s1009_s3 + $0x58] sm:$0xff]  ;;  %v415_v22 = vld [vmem:[%s1009_s3 + $0x50] sm:$0xff] }
  0x12   : > { %363 = vmatpush.msra.mxu0 %v352_v3  ;;  %v417_v19 = vld [vmem:[%s1009_s3 + $0x60] sm:$0xff]  ;;  %v414_v23 = vld [vmem:[%s1009_s3 + $0x48] sm:$0xff]  ;;  %v338_v26 = vld [vmem:[%s328_s11 + $0x10] sm:$0xff] }
  0x13   : > { %426 = vmatpush.msra.mxu1 %v419_v15  ;;  %v336_v20 = vld [vmem:[%s328_s11] sm:$0xff]  ;;  %v337_v25 = vld [vmem:[%s328_s11 + $0x8] sm:$0xff]  ;;  %v339_v27 = vld [vmem:[%s328_s11 + $0x18] sm:$0xff] }
  0x14   : > { %364 = vmatpush.msra.mxu0 %v351_v4  ;;  %v413_v24 = vld [vmem:[%s1009_s3 + $0x40] sm:$0xff]  ;;  %v412_v28 = vld [vmem:[%s1009_s3 + $0x38] sm:$0xff]  ;;  %v411_v29 = vld [vmem:[%s1009_s3 + $0x30] sm:$0xff] }
  0x15   : > { %427 = vmatpush.msra.mxu1 %v418_v17  ;;  %v410_v30 = vld [vmem:[%s1009_s3 + $0x28] sm:$0xff]  ;;  %v409_v31 = vld [vmem:[%s1009_s3 + $0x20] sm:$0xff]  ;;  %v408_v32 = vld [vmem:[%s1009_s3 + $0x18] sm:$0xff] }
  0x16   : > { %365 = vmatpush.msra.mxu0 %v350_v5  ;;  %v407_v33 = vld [vmem:[%s1009_s3 + $0x10] sm:$0xff]  ;;  %v406_v34 = vld [vmem:[%s1009_s3 + $0x8] sm:$0xff]  ;;  %v405_v35 = vld [vmem:[%s1009_s3] sm:$0xff] }
  0x17   : > { %428 = vmatpush.msra.mxu1 %v417_v19  ;;  %v680_v36 = vld [vmem:[%s1008_s2] ss:$0 sm:$0xff]  ;;  %v485_v41 = vld [vmem:[%s1011_s5 + $0x78] sm:$0xff]  ;;  %v484_v42 = vld [vmem:[%s1011_s5 + $0x70] sm:$0xff] }
  0x18   : > { %366 = vmatpush.msra.mxu0 %v349_v6  ;;  %490 = vmatpush.msra.mxu2 %v485_v41  ;;  %v483_v44 = vld [vmem:[%s1011_s5 + $0x68] sm:$0xff]  ;;  %v482_v48 = vld [vmem:[%s1011_s5 + $0x60] sm:$0xff]  ;;  %v481_v50 = vld [vmem:[%s1011_s5 + $0x58] sm:$0xff] }
  0x19   : > { %429 = vmatpush.msra.mxu1 %v416_v21  ;;  %v480_v52 = vld [vmem:[%s1011_s5 + $0x50] sm:$0xff]  ;;  %v479_v54 = vld [vmem:[%s1011_s5 + $0x48] sm:$0xff]  ;;  %v478_v58 = vld [vmem:[%s1011_s5 + $0x40] sm:$0xff] }
  0x1a   : > { %367 = vmatpush.msra.mxu0 %v348_v7  ;;  %491 = vmatpush.msra.mxu2 %v484_v42  ;;  %v477_v5 = vld [vmem:[%s1011_s5 + $0x38] sm:$0xff]  ;;  %v476_v6 = vld [vmem:[%s1011_s5 + $0x30] sm:$0xff]  ;;  %v475_v7 = vld [vmem:[%s1011_s5 + $0x28] sm:$0xff] }
  0x1b   : > { %430 = vmatpush.msra.mxu1 %v415_v22  ;;  %v549_v19 = vld [vmem:[%s1013_s7 + $0x70] sm:$0xff]  ;;  %v548_v21 = vld [vmem:[%s1013_s7 + $0x68] sm:$0xff] }
  0x1c   : > { %368 = vmatpush.msra.mxu0 %v347_v8  ;;  %492 = vmatpush.msra.mxu2 %v483_v44  ;;  %v474_v8 = vld [vmem:[%s1011_s5 + $0x20] sm:$0xff] }
  0x1d   : > { %431 = vmatpush.msra.mxu1 %v414_v23 }
  0x1e   : > { %369 = vmatpush.msra.mxu0 %v346_v9  ;;  %493 = vmatpush.msra.mxu2 %v482_v48  ;;  %v473_v9 = vld [vmem:[%s1011_s5 + $0x18] sm:$0xff]  ;;  %v540_v48 = vld [vmem:[%s1013_s7 + $0x28] sm:$0xff] }
  0x1f   : > { %432 = vmatpush.msra.mxu1 %v413_v24 }
  0x20   : > { %370 = vmatpush.msra.mxu0 %v345_v10  ;;  %494 = vmatpush.msra.mxu2 %v481_v50  ;;  %v472_v10 = vld [vmem:[%s1011_s5 + $0x10] sm:$0xff]  ;;  %v538_v50 = vld [vmem:[%s1013_s7 + $0x18] sm:$0xff] }
  0x21   : > { %433 = vmatpush.msra.mxu1 %v412_v28 }
  0x22   : > { %371 = vmatpush.msra.mxu0 %v344_v11  ;;  %495 = vmatpush.msra.mxu2 %v480_v52  ;;  %v471_v11 = vld [vmem:[%s1011_s5 + $0x8] sm:$0xff] }
  0x23   : > { %434 = vmatpush.msra.mxu1 %v411_v29  ;;  %v545_v29 = vld [vmem:[%s1013_s7 + $0x50] sm:$0xff]  ;;  %v536_v52 = vld [vmem:[%s1013_s7 + $0x8] sm:$0xff] }
  0x24   : > { %372 = vmatpush.msra.mxu0 %v343_v12  ;;  %496 = vmatpush.msra.mxu2 %v479_v54  ;;  %v470_v12 = vld [vmem:[%s1011_s5] sm:$0xff] }
  0x25   : > { %435 = vmatpush.msra.mxu1 %v410_v30  ;;  %v682_v54 = vld [vmem:[%s1012_s6] ss:$0 sm:$0xff] }
  0x26   : > { %373 = vmatpush.msra.mxu0 %v342_v13  ;;  %497 = vmatpush.msra.mxu2 %v478_v58  ;;  %v681_v13 = vld [vmem:[%s1010_s4] ss:$0 sm:$0xff] }
  0x27   : > { %436 = vmatpush.msra.mxu1 %v409_v31  ;;  %v544_v31 = vld [vmem:[%s1013_s7 + $0x48] sm:$0xff] }
  0x28   : > { %374 = vmatpush.msra.mxu0 %v341_v16  ;;  %498 = vmatpush.msra.mxu2 %v477_v5 }
  0x29   : > { %437 = vmatpush.msra.mxu1 %v408_v32 }
  0x2a   : > { %375 = vmatpush.msra.mxu0 %v340_v18  ;;  %499 = vmatpush.msra.mxu2 %v476_v6  ;;  %v550_v18 = vld [vmem:[%s1013_s7 + $0x78] sm:$0xff] }
  0x2b   : > { %376 = vmatmul.f32.vlgmr.msra.gmra.mxu0 %v336_v20  ;;  %438 = vmatpush.msra.mxu1 %v407_v33 }
  0x2c   : > { %500 = vmatpush.msra.mxu2 %v475_v7  ;;  %555 = vmatpush.msra.mxu3 %v550_v18 }
  0x2d   : > { %439 = vmatpush.msra.mxu1 %v406_v34 }
  0x2e   : > { %501 = vmatpush.msra.mxu2 %v474_v8  ;;  %556 = vmatpush.msra.mxu3 %v549_v19 }
  0x2f   : > { %440 = vmatpush.msra.mxu1 %v405_v35  ;;  %v543_v35 = vld [vmem:[%s1013_s7 + $0x40] sm:$0xff] }
  0x30   : > { %502 = vmatpush.msra.mxu2 %v473_v9  ;;  %557 = vmatpush.msra.mxu3 %v548_v21 }
  0x32   : > { %503 = vmatpush.msra.mxu2 %v472_v10 }
  0x33   : > { %379 = vmatmul.f32.gmra.mxu0 %v337_v25  ;;  %v547_v25 = vld [vmem:[%s1013_s7 + $0x60] sm:$0xff] }
  0x34   : > { %504 = vmatpush.msra.mxu2 %v471_v11  ;;  %558 = vmatpush.msra.mxu3 %v547_v25 }
  0x36   : > { %505 = vmatpush.msra.mxu2 %v470_v12 }
  0x3b   : > { %382 = vmatmul.f32.gmra.mxu0 %v338_v26 }
  0x43   : > { %385 = vmatmul.f32.gmra.mxu0 %v339_v27  ;;  %v546_v27 = vld [vmem:[%s1013_s7 + $0x58] sm:$0xff] }
  0x44   : > { %559 = vmatpush.msra.mxu3 %v546_v27 }
  0x46   : > { %560 = vmatpush.msra.mxu3 %v545_v29 }
  0x48   : > { %561 = vmatpush.msra.mxu3 %v544_v31 }
  0x4a   : > { %562 = vmatpush.msra.mxu3 %v543_v35 }
  0xa8   : > { %v377_v37 = vpop.f32.mrf.mxu0 }
  0xa9   : > { %v378_v38 = vadd.f32 %v680_v36, %v377_v37 }
  0xab   : > { %v389_v39 = vmul.f32 0.5, %v378_v38 }
  0xad   : > { %684 = vtanh.f32 %v389_v39 }
  0xb0   : > { %v380_v40 = vpop.f32.mrf.mxu0 }
  0xb1   : > { %v381_v43 = vadd.f32 %v680_v36, %v380_v40 }
  0xb3   : > { %v685_v45 = vpop.eup %684  ;;  %v390_v46 = vmul.f32 0.5, %v381_v43 }
  0xb4   : > { %v397_v47 = vmul.f32 0.5, %v685_v45 }
  0xb5   : > { %686 = vtanh.f32 %v390_v46  ;;  %v542_v46 = vld [vmem:[%s1013_s7 + $0x38] sm:$0xff] }
  0xb6   : > { %v401_v49 = vadd.f32 0.5, %v397_v47  ;;  %563 = vmatpush.msra.mxu3 %v542_v46  ;;  %v541_v47 = vld [vmem:[%s1013_s7 + $0x30] sm:$0xff] }
  0xb8   : > { %v383_v51 = vpop.f32.mrf.mxu0  ;;  %441 = vmatmul.f32.vlgmr.msra.gmra.mxu1 %v401_v49  ;;  %564 = vmatpush.msra.mxu3 %v541_v47  ;;  %v539_v49 = vld [vmem:[%s1013_s7 + $0x20] sm:$0xff] }
  0xb9   : > { %v384_v53 = vadd.f32 %v680_v36, %v383_v51  ;;  %v537_v51 = vld [vmem:[%s1013_s7 + $0x10] sm:$0xff] }
  0xba   : > { %565 = vmatpush.msra.mxu3 %v540_v48 }
  0xbb   : > { %v687_v55 = vpop.eup %686  ;;  %v391_v56 = vmul.f32 0.5, %v384_v53  ;;  %v535_v53 = vld [vmem:[%s1013_s7] sm:$0xff] }
  0xbc   : > { %v398_v57 = vmul.f32 0.5, %v687_v55  ;;  %566 = vmatpush.msra.mxu3 %v539_v49 }
  0xbd   : > { %688 = vtanh.f32 %v391_v56 }
  0xbe   : > { %v402_v59 = vadd.f32 0.5, %v398_v57  ;;  %567 = vmatpush.msra.mxu3 %v538_v50 }
  0xc0   : > { %v386_v60 = vpop.f32.mrf.mxu0  ;;  %444 = vmatmul.f32.gmra.mxu1 %v402_v59  ;;  %568 = vmatpush.msra.mxu3 %v537_v51 }
  0xc1   : > { %v387_v61 = vadd.f32 %v680_v36, %v386_v60 }
  0xc2   : > { %569 = vmatpush.msra.mxu3 %v536_v52 }
  0xc3   : > { %v689_v62 = vpop.eup %688  ;;  %v392_v63 = vmul.f32 0.5, %v387_v61 }
  0xc4   : > { %v399_v0 = vmul.f32 0.5, %v689_v62  ;;  %570 = vmatpush.msra.mxu3 %v535_v53 }
  0xc5   : > { %690 = vtanh.f32 %v392_v63 }
  0xc6   : > { %v403_v1 = vadd.f32 0.5, %v399_v0 }
  0xc8   : > { %447 = vmatmul.f32.gmra.mxu1 %v403_v1 }
  0xcb   : > { %v691_v2 = vpop.eup %690 }
  0xcc   : > { %v400_v3 = vmul.f32 0.5, %v691_v2 }
  0xce   : > { %v404_v4 = vadd.f32 0.5, %v400_v3 }
  0xd0   : > { %450 = vmatmul.f32.gmra.mxu1 %v404_v4 }
 0x135   : > { %v442_v14 = vpop.f32.mrf.mxu1 }
 0x136   : > { %v443_v15 = vadd.f32 %v681_v13, %v442_v14 }
 0x138   : > { %v454_v16 = vmul.f32 0.5, %v443_v15  ;;  %v683_v15 = vld [vmem:[%s1014_s8] ss:$0 sm:$0xff] }
 0x13a   : > { %692 = vtanh.f32 %v454_v16 }
 0x13d   : > { %v445_v17 = vpop.f32.mrf.mxu1 }
 0x13e   : > { %v446_v20 = vadd.f32 %v681_v13, %v445_v17 }
 0x140   : > { %v693_v22 = vpop.eup %692  ;;  %v455_v23 = vmul.f32 0.5, %v446_v20 }
 0x141   : > { %v462_v24 = vmul.f32 0.5, %v693_v22 }
 0x142   : > { %694 = vtanh.f32 %v455_v23 }
 0x143   : > { %v466_v26 = vadd.f32 0.5, %v462_v24 }
 0x145   : > { %v448_v28 = vpop.f32.mrf.mxu1  ;;  %506 = vmatmul.f32.vlgmr.msra.gmra.mxu2 %v466_v26 }
 0x146   : > { %v449_v30 = vadd.f32 %v681_v13, %v448_v28 }
 0x148   : > { %v695_v32 = vpop.eup %694  ;;  %v456_v33 = vmul.f32 0.5, %v449_v30 }
 0x149   : > { %v463_v34 = vmul.f32 0.5, %v695_v32 }
 0x14a   : > { %696 = vtanh.f32 %v456_v33 }
 0x14b   : > { %v467_v36 = vadd.f32 0.5, %v463_v34 }
 0x14d   : > { %v451_v37 = vpop.f32.mrf.mxu1  ;;  %509 = vmatmul.f32.gmra.mxu2 %v467_v36 }
 0x14e   : > { %v452_v38 = vadd.f32 %v681_v13, %v451_v37 }
 0x150   : > { %v697_v39 = vpop.eup %696  ;;  %v457_v40 = vmul.f32 0.5, %v452_v38 }
 0x151   : > { %v464_v41 = vmul.f32 0.5, %v697_v39 }
 0x152   : > { %698 = vtanh.f32 %v457_v40 }
 0x153   : > { %v468_v42 = vadd.f32 0.5, %v464_v41 }
 0x155   : > { %512 = vmatmul.f32.gmra.mxu2 %v468_v42 }
 0x158   : > { %v699_v43 = vpop.eup %698 }
 0x159   : > { %v465_v44 = vmul.f32 0.5, %v699_v43 }
 0x15b   : > { %v469_v45 = vadd.f32 0.5, %v465_v44 }
 0x15d   : > { %515 = vmatmul.f32.gmra.mxu2 %v469_v45 }
 0x1c8   : > { %v507_v55 = vpop.f32.mrf.mxu2 }
 0x1c9   : > { %v508_v56 = vadd.f32 %v682_v54, %v507_v55 }
 0x1cb   : > { %v519_v57 = vmul.f32 0.5, %v508_v56 }
 0x1cd   : > { %700 = vtanh.f32 %v519_v57 }
 0x1d0   : > { %v510_v58 = vpop.f32.mrf.mxu2 }
 0x1d1   : > { %v511_v59 = vadd.f32 %v682_v54, %v510_v58 }
 0x1d3   : > { %v701_v60 = vpop.eup %700  ;;  %v520_v61 = vmul.f32 0.5, %v511_v59 }
 0x1d4   : > { %v527_v62 = vmul.f32 0.5, %v701_v60 }
 0x1d5   : > { %702 = vtanh.f32 %v520_v61 }
 0x1d6   : > { %v531_v63 = vadd.f32 0.5, %v527_v62 }
 0x1d8   : > { %v513_v0 = vpop.f32.mrf.mxu2  ;;  %571 = vmatmul.f32.vlgmr.msra.gmra.mxu3 %v531_v63 }
 0x1d9   : > { %v514_v1 = vadd.f32 %v682_v54, %v513_v0 }
 0x1db   : > { %v703_v2 = vpop.eup %702  ;;  %v521_v3 = vmul.f32 0.5, %v514_v1 }
 0x1dc   : > { %v528_v4 = vmul.f32 0.5, %v703_v2 }
 0x1dd   : > { %704 = vtanh.f32 %v521_v3 }
 0x1de   : > { %v532_v5 = vadd.f32 0.5, %v528_v4 }
 0x1e0   : > { %v516_v6 = vpop.f32.mrf.mxu2  ;;  %574 = vmatmul.f32.gmra.mxu3 %v532_v5 }
 0x1e1   : > { %v517_v7 = vadd.f32 %v682_v54, %v516_v6 }
 0x1e3   : > { %v705_v8 = vpop.eup %704  ;;  %v522_v9 = vmul.f32 0.5, %v517_v7 }
 0x1e4   : > { %v529_v10 = vmul.f32 0.5, %v705_v8 }
 0x1e5   : > { %706 = vtanh.f32 %v522_v9 }
 0x1e6   : > { %v533_v11 = vadd.f32 0.5, %v529_v10 }
 0x1e8   : > { %577 = vmatmul.f32.gmra.mxu3 %v533_v11 }
 0x1eb   : > { %v707_v12 = vpop.eup %706 }
 0x1ec   : > { %v530_v13 = vmul.f32 0.5, %v707_v12 }
 0x1ee   : > { %v534_v14 = vadd.f32 0.5, %v530_v13 }
 0x1f0   : > { %580 = vmatmul.f32.gmra.mxu3 %v534_v14 }
 0x25b   : > { %v572_v16 = vpop.f32.mrf.mxu3 }
 0x25c   : > { %v573_v17 = vadd.f32 %v683_v15, %v572_v16 }
 0x25e   : > { %v584_v18 = vmul.f32 0.5, %v573_v17 }
 0x260   : > { %708 = vtanh.f32 %v584_v18 }
 0x263   : > { %v575_v19 = vpop.f32.mrf.mxu3 }
 0x264   : > { %v576_v20 = vadd.f32 %v683_v15, %v575_v19 }
 0x266   : > { %v709_v21 = vpop.eup %708  ;;  %v585_v22 = vmul.f32 0.5, %v576_v20 }
 0x267   : > { %v592_v23 = vmul.f32 0.5, %v709_v21 }
 0x268   : > { %710 = vtanh.f32 %v585_v22 }
 0x269   : > { %v596_v24 = vadd.f32 0.5, %v592_v23 }
 0x26b   : > { %601 = vst.msk [vmem:[%s334_s26] sm:$0xff] %vm600_vm0, %v596_v24  ;;  %v578_v25 = vpop.f32.mrf.mxu3 }
 0x26c   : > { %v579_v26 = vadd.f32 %v683_v15, %v578_v25 }
 0x26e   : > { %v711_v27 = vpop.eup %710  ;;  %v586_v28 = vmul.f32 0.5, %v579_v26 }
 0x26f   : > { %v593_v29 = vmul.f32 0.5, %v711_v27 }
 0x270   : > { %712 = vtanh.f32 %v586_v28 }
 0x271   : > { %v597_v30 = vadd.f32 0.5, %v593_v29 }
 0x273   : > { %602 = vst.msk [vmem:[%s334_s26 + $0x8] sm:$0xff] %vm600_vm0, %v597_v30  ;;  %v581_v31 = vpop.f32.mrf.mxu3 }
 0x274   : > { %v582_v32 = vadd.f32 %v683_v15, %v581_v31 }
 0x276   : > { %v713_v33 = vpop.eup %712  ;;  %v587_v34 = vmul.f32 0.5, %v582_v32 }
 0x277   : > { %v594_v35 = vmul.f32 0.5, %v713_v33 }
 0x278   : > { %714 = vtanh.f32 %v587_v34 }
 0x279   : > { %v598_v36 = vadd.f32 0.5, %v594_v35 }
 0x27b   : > { %603 = vst.msk [vmem:[%s334_s26 + $0x10] sm:$0xff] %vm600_vm0, %v598_v36 }
 0x27e   : > { %v715_v37 = vpop.eup %714 }
 0x27f   : > { %v595_v38 = vmul.f32 0.5, %v715_v37 }
 0x281   : > { %v599_v39 = vadd.f32 0.5, %v595_v38 }
 0x283   : > { %604 = vst.msk [vmem:[%s334_s26 + $0x18] sm:$0xff] %vm600_vm0, %v599_v39 }
 0x284 PF: > { %s19_s30 = sadd.s32 1, %s722_s30  }
 0x285   : > { %p16_p4 = scmp.ge.s32.totalorder %s19_s30, 4  }
 0x287   :  { %18 = sbr.rel (!%p16_p4) target bundleno = 1 (0x1), region = 86 }

</bundles_post_ra>
